<compile_context>
chip_gen: v7x
topology: tpu7x:2x2x1
jax: 0.10.0
libtpu: 0.0.40
codegen_flags: <defaults>
</compile_context>

<pallas_src>
import functools

import jax
import jax.numpy as jnp
from jax.experimental import pallas as pl
from jax.experimental.pallas import tpu as pltpu


_MAX_TILE_N = 1024   # ~85% of HBM roofline is reached at 512-1024 row tiles
_MIN_TILE_N = 16     # bf16 sublane packing => keep tiles multiples of 16


def _round_up(v, m):
    return ((v + m - 1) // m) * m


def _cdiv(a, b):
    return -(-a // b)


# --------------------------------------------------------------------------
# Fused single-call kernel: per-instance work + online softmax + classifier.
# Grid over N tiles ("arbitrary" -- accumulators carried in VMEM scratch).
# --------------------------------------------------------------------------
def fused_kernel(x_ref, wbig_ref, bb_ref, wa1_ref, ba1_ref, wa2_ref, ba2_ref,
                 wc_ref, bc_ref, out_ref, m_sc, l_sc, acc_sc, *, n_valid, tile_n):
    i = pl.program_id(0)

    @pl.when(i == 0)
    def _():
        m_sc[...] = jnp.full_like(m_sc, -jnp.inf)
        l_sc[...] = jnp.zeros_like(l_sc)
        acc_sc[...] = jnp.zeros_like(acc_sc)

    # Fused GAP + backbone Linear: one K = C*H*W MXU contraction (bf16 in, f32 acc).
    feats = jnp.dot(x_ref[...], wbig_ref[...],
                    preferred_element_type=jnp.float32) + bb_ref[...]      # (tile_n, IH_pad)

    # Attention MLP: Linear(IH->HID) -> tanh (EUP) -> Linear(HID->1)
    t = jnp.tanh(jnp.dot(feats, wa1_ref[...],
                         preferred_element_type=jnp.float32) + ba1_ref[...])
    scores = jnp.sum(t * wa2_ref[...], axis=-1, keepdims=True) + ba2_ref[...]  # (tile_n, 1)

    # Ragged-tail mask (rows >= n_valid are garbage from the clamped input DMA).
    row = jax.lax.broadcasted_iota(jnp.int32, scores.shape, 0) + i * tile_n
    valid = row < n_valid
    s = jnp.where(valid, scores, -jnp.inf)
    feats = jnp.where(valid, feats, 0.0)

    # Online softmax accumulation across tiles.
    m_prev = m_sc[...]
    m_new = jnp.maximum(m_prev, jnp.max(s, axis=0, keepdims=True))        # (1, 1)
    alpha = jnp.exp(m_prev - m_new)
    p = jnp.exp(s - m_new)                                                # (tile_n, 1)
    l_sc[...] = alpha * l_sc[...] + jnp.sum(p, axis=0, keepdims=True)
    acc_sc[...] = alpha * acc_sc[...] + jnp.sum(p * feats, axis=0, keepdims=True)
    m_sc[...] = m_new

    @pl.when(i == pl.num_programs(0) - 1)
    def _():
        agg = acc_sc[...] / l_sc[...]                                     # exact softmax denom
        out_ref[...] = jnp.dot(agg, wc_ref[...],
                               preferred_element_type=jnp.float32) + bc_ref[...]


# --------------------------------------------------------------------------
# Two-pass form (used on multi-TensorCore chips, e.g. v7x, with >= 2 tiles).
# Pass 1: per-instance features + attention score, packed into one lane-dense
#         (tile_n, IH_pad) slab (score lives in spare lane `score_lane`).
# --------------------------------------------------------------------------
def instance_kernel(x_ref, wbig_ref, bb_ref, wa1_ref, ba1_ref, wa2_ref, ba2_ref,
                    packed_ref, *, score_lane):
    feats = jnp.dot(x_ref[...], wbig_ref[...],
                    preferred_element_type=jnp.float32) + bb_ref[...]
    t = jnp.tanh(jnp.dot(feats, wa1_ref[...],
                         preferred_element_type=jnp.float32) + ba1_ref[...])
    scores = jnp.sum(t * wa2_ref[...], axis=-1, keepdims=True) + ba2_ref[...]
    lane = jax.lax.broadcasted_iota(jnp.int32, feats.shape, 1)
    packed_ref[...] = jnp.where(lane == score_lane, scores, feats)


# Pass 2: masked softmax over instances + weighted aggregation + classifier.
# feats/scores are tiny (N * IH_pad * 4 bytes), so one VMEM-resident call.
# TODO(synk): for extremely large bags (N*IH_pad*4 > VMEM) tile this pass too
#             with an online softmax (see fused_kernel).
def finalize_kernel(packed_ref, wc_ref, bc_ref, out_ref, *, n_valid, score_lane):
    fp = packed_ref[...]                                      # (n_tot, IH_pad)
    row = jax.lax.broadcasted_iota(jnp.int32, fp.shape, 0)
    lane = jax.lax.broadcasted_iota(jnp.int32, fp.shape, 1)
    valid_row = row < n_valid

    # Extract per-row score (lane `score_lane`) via a masked lane-max; padded
    # / garbage rows become -inf.
    s_col = jnp.where(jnp.logical_and(valid_row, lane == score_lane), fp, -jnp.inf)
    s = jnp.max(s_col, axis=1, keepdims=True)                 # (n_tot, 1)

    m = jnp.max(s, axis=0, keepdims=True)
    e = jnp.exp(s - m)                                        # invalid rows -> 0
    w = e / jnp.sum(e, axis=0, keepdims=True)                 # exact reciprocal

    feats = jnp.where(valid_row, fp, 0.0)                     # zero garbage rows
    agg = jnp.sum(w * feats, axis=0, keepdims=True)           # (1, IH_pad)
    # score lane of `agg` is killed by the zero row in wc_pad.
    out_ref[...] = jnp.dot(agg, wc_ref[...],
                           preferred_element_type=jnp.float32) + bc_ref[...]


# --------------------------------------------------------------------------
# Parameters (same layout conventions as torch Linear, matching the module).
# --------------------------------------------------------------------------
def init_params(key, in_channels, instance_hidden_size, hidden_size, num_classes):
    ks = jax.random.split(key, 5)
    scale = 0.5
    return dict(
        wb=scale * jax.random.normal(ks[0], (in_channels, instance_hidden_size), jnp.float32),
        bb=jnp.zeros((1, instance_hidden_size), jnp.float32),
        wa1=scale * jax.random.normal(ks[1], (instance_hidden_size, hidden_size), jnp.float32),
        ba1=jnp.zeros((1, hidden_size), jnp.float32),
        # torch Linear(hidden, 1).weight has shape (1, hidden); keep that layout
        wa2=scale * jax.random.normal(ks[2], (1, hidden_size), jnp.float32),
        ba2=jnp.zeros((1, 1), jnp.float32),
        wc=scale * jax.random.normal(ks[3], (instance_hidden_size, num_classes), jnp.float32),
        bc=jnp.zeros((1, num_classes), jnp.float32),
    )


# --------------------------------------------------------------------------
# Forward wrapper.
# --------------------------------------------------------------------------
def attention_model_forward(x, params, num_classes, *, tile_n_override=None,
                            force_two_pass=False, force_fused=False):
    # x: (1, N, C, H, W) -> squeeze bag dim, flatten (C,H,W) -> C*H*W (glue only)
    x = jnp.squeeze(x, axis=0)
    n, c, h, w = x.shape
    if n < 1:
        raise ValueError("empty bag")
    hw = h * w
    chw = c * hw
    x2d = x.reshape(n, chw).astype(jnp.bfloat16)   # bf16 halves HBM read traffic

    ih = params["wb"].shape[1]
    hid = params["wa1"].shape[1]
    ih_pad = _round_up(ih + 1, 128)                # >=1 spare lane for the packed score
    nc_pad = _round_up(max(num_classes, 1), 128)
    score_lane = ih

    # Fused GAP + backbone-Linear weight: W_big[c*HW + s, j] = wb[c, j] / HW.
    # TODO(synk): cache W_big across forward calls (it only depends on params & HW).
    w_big = jnp.zeros((chw, ih_pad), jnp.float32)
    w_big = w_big.at[:, :ih].set(
        jnp.repeat(params["wb"].astype(jnp.float32), hw, axis=0) * (1.0 / float(hw)))
    w_big = w_big.astype(jnp.bfloat16)

    bb = jnp.zeros((1, ih_pad), jnp.float32).at[:, :ih].set(params["bb"])
    wa1 = jnp.zeros((ih_pad, hid), jnp.float32).at[:ih, :].set(params["wa1"])
    ba1 = params["ba1"].astype(jnp.float32).reshape(1, hid)
    wa2 = params["wa2"].astype(jnp.float32).reshape(1, hid)
    ba2 = params["ba2"].astype(jnp.float32).reshape(1, 1)
    wc = jnp.zeros((ih_pad, nc_pad), jnp.float32).at[:ih, :num_classes].set(params["wc"])
    bc = jnp.zeros((1, nc_pad), jnp.float32).at[:, :num_classes].set(params["bc"])

    # ---- per-generation VMEM budget -> tile size ---------------------------
    try:
        vmem_cap = int(pltpu.get_tpu_info().vmem_capacity_bytes)
    except Exception:
        vmem_cap = 64 << 20                         # conservative (v7x) fallback
    vmem_budget = (vmem_cap * 3) // 4               # ~48 MiB on v7x, ~96 MiB on v5e/v6e

    # Constant-index weights still get double-buffered by default.
    # TODO(synk): for huge backbone weights, single-buffer them (pl.Buffered(1)).
    weight_bytes = 2 * (chw * ih_pad * 2
                        + (ih_pad * hid + ih_pad * nc_pad
                           + 4 * hid + ih_pad + nc_pad + 4) * 4)
    x_row_bytes = chw * 2                           # bf16 activation row
    out_row_bytes = ih_pad * 4                      # packed output row (two-pass only)

    avail = max(vmem_budget - weight_bytes - (4 << 20), 1 << 20)
    tile_n = avail // (2 * (x_row_bytes + out_row_bytes))
    tile_n = max(_MIN_TILE_N,
                 (min(_MAX_TILE_N, tile_n, _round_up(n, 16)) // 16) * 16)
    if tile_n_override is not None:
        tile_n = max(_MIN_TILE_N, _round_up(int(tile_n_override), 16))
    grid_steps = _cdiv(n, tile_n)

    # ---- path selection -----------------------------------------------------
    kind = getattr(jax.devices()[0], "device_kind", "").replace(" ", "").lower()
    multi_tc = ("v7" in kind) or ("tpu7" in kind)   # v7x: 2 TensorCores / chip
    if (multi_tc and not force_fused and tile_n_override is None
            and grid_steps == 1 and n > 2 * _MIN_TILE_N):
        # Split so the "parallel" grid can feed both TensorCores.
        tile_n = max(_MIN_TILE_N, _round_up(_cdiv(n, 2), 16))
        grid_steps = _cdiv(n, tile_n)
    use_two_pass = force_two_pass or (multi_tc and grid_steps >= 2 and not force_fused)

    step_bytes = 2 * tile_n * x_row_bytes + (2 * tile_n * out_row_bytes if use_two_pass else 0)
    vmem_limit = int(min(vmem_budget, max(32 << 20, weight_bytes + step_bytes + (8 << 20))))

    cost = pl.CostEstimate(
        flops=int(2 * n * (chw * ih_pad + ih_pad * hid + hid) + 2 * ih_pad * nc_pad),
        transcendentals=int(n * (hid + 1)),
        bytes_accessed=int(n * chw * 2 + chw * ih_pad * 2
                           + (n * ih_pad * 4 if use_two_pass else 0) + nc_pad * 4),
    )

    x_spec = pl.BlockSpec((tile_n, chw), lambda i: (i, 0))   # pipelined over N (ragged tail ok)
    weight_specs = [                                          # constant index_map -> VMEM-resident
        pl.BlockSpec((chw, ih_pad), lambda i: (0, 0)),
        pl.BlockSpec((1, ih_pad), lambda i: (0, 0)),
        pl.BlockSpec((ih_pad, hid), lambda i: (0, 0)),
        pl.BlockSpec((1, hid), lambda i: (0, 0)),
        pl.BlockSpec((1, hid), lambda i: (0, 0)),
        pl.BlockSpec((1, 1), lambda i: (0, 0)),
    ]

    if not use_two_pass:
        # Single fused call (single-TC chips and single-tile bags).
        out_pad = pl.pallas_call(
            functools.partial(fused_kernel, n_valid=n, tile_n=tile_n),
            out_shape=jax.ShapeDtypeStruct((1, nc_pad), jnp.float32),
            grid_spec=pltpu.PrefetchScalarGridSpec(
                num_scalar_prefetch=0,
                grid=(grid_steps,),
                in_specs=[x_spec] + weight_specs + [
                    pl.BlockSpec((ih_pad, nc_pad), lambda i: (0, 0)),
                    pl.BlockSpec((1, nc_pad), lambda i: (0, 0)),
                ],
                out_specs=pl.BlockSpec((1, nc_pad), lambda i: (0, 0)),
                scratch_shapes=[pltpu.VMEM((1, 1), jnp.float32),
                                pltpu.VMEM((1, 1), jnp.float32),
                                pltpu.VMEM((1, ih_pad), jnp.float32)],
            ),
            compiler_params=pltpu.CompilerParams(
                dimension_semantics=("arbitrary",),
                vmem_limit_bytes=vmem_limit,
            ),
            cost_estimate=cost,
        )(x2d, w_big, bb, wa1, ba1, wa2, ba2, wc, bc)
    else:
        # Pass 1: parallel over tiles (shards across TensorCores on v7x).
        n_tot = grid_steps * tile_n
        packed = pl.pallas_call(
            functools.partial(instance_kernel, score_lane=score_lane),
            out_shape=jax.ShapeDtypeStruct((n_tot, ih_pad), jnp.float32),
            grid_spec=pltpu.PrefetchScalarGridSpec(
                num_scalar_prefetch=0,
                grid=(grid_steps,),
                in_specs=[x_spec] + weight_specs,
                out_specs=pl.BlockSpec((tile_n, ih_pad), lambda i: (i, 0)),
            ),
            compiler_params=pltpu.CompilerParams(
                dimension_semantics=("parallel",),
                vmem_limit_bytes=vmem_limit,
            ),
            cost_estimate=cost,
        )(x2d, w_big, bb, wa1, ba1, wa2, ba2)

        # Pass 2: tiny VMEM-resident finalize.
        vmem = pl.BlockSpec(memory_space=pltpu.MemorySpace.VMEM)
        out_pad = pl.pallas_call(
            functools.partial(finalize_kernel, n_valid=n, score_lane=score_lane),
            out_shape=jax.ShapeDtypeStruct((1, nc_pad), jnp.float32),
            in_specs=[vmem, vmem, vmem],
            out_specs=vmem,
        )(packed, wc, bc)

    classification = out_pad[:, :num_classes]
    return classification, None


# --------------------------------------------------------------------------
# Pure-JAX f32 reference of the same forward (stand-in backbone = GAP + Linear).
# --------------------------------------------------------------------------
def _reference_forward(x, params):
    xb = jnp.squeeze(x, axis=0)
    n_, c_, h_, w_ = xb.shape
    gap = jnp.mean(xb.reshape(n_, c_, h_ * w_), axis=-1)
    feats = gap @ params["wb"] + params["bb"]
    t = jnp.tanh(feats @ params["wa1"] + params["ba1"])
    sc = jnp.sum(t * params["wa2"], axis=-1, keepdims=True) + params["ba2"]
    wgt = jax.nn.softmax(sc, axis=0)
    agg = jnp.sum(wgt * feats, axis=0, keepdims=True)
    return agg @ params["wc"] + params["bc"]


if __name__ == "__main__":
    C, H, W = 4, 16, 16
    INSTANCE_HIDDEN, HIDDEN, NUM_CLASSES = 32, 64, 2

    key = jax.random.PRNGKey(0)
    kp, kx1, kx2 = jax.random.split(key, 3)
    params = init_params(kp, C, INSTANCE_HIDDEN, HIDDEN, NUM_CLASSES)

    tol = dict(rtol=5e-2, atol=5e-2)  # bf16 activation path vs f32 reference

    # Test 1: tiny bag -> single tile, fused single-call path on every chip.
    x_small = jax.random.normal(kx1, (1, 8, C, H, W), jnp.float32)
    out, aux = attention_model_forward(x_small, params, NUM_CLASSES)
    out = jax.block_until_ready(out)
    assert out.shape == (1, NUM_CLASSES) and aux is None
    ref1 = _reference_forward(x_small, params)
    assert jnp.allclose(out, ref1, **tol), (out, ref1)

    # Test 2: multi-tile ragged bag through the fused online-softmax path
    # (exercises cross-tile accumulation and the ragged-tail mask, no jnp.pad).
    x_big = jax.random.normal(kx2, (1, 40, C, H, W), jnp.float32)
    out2, _ = attention_model_forward(x_big, params, NUM_CLASSES,
                                      tile_n_override=16, force_fused=True)
    out2 = jax.block_until_ready(out2)
    ref2 = _reference_forward(x_big, params)
    assert jnp.allclose(out2, ref2, **tol), (out2, ref2)

    # Test 3: same bag through the two-pass (multi-TensorCore / v7x) path.
    out3, _ = attention_model_forward(x_big, params, NUM_CLASSES,
                                      tile_n_override=16, force_two_pass=True)
    out3 = jax.block_until_ready(out3)
    assert jnp.allclose(out3, ref2, **tol), (out3, ref2)

    print("KERNEL_OK")
</pallas_src>

<mosaic_0001>
module attributes {stable_mosaic.version = 11 : i64} {
  func.func @fused_kernel(%arg0: i32, %arg1: memref<16x1024xbf16, #tpu.memory_space<vmem>>, %arg2: memref<1024x128xbf16, #tpu.memory_space<vmem>>, %arg3: memref<1x128xf32, #tpu.memory_space<vmem>>, %arg4: memref<128x64xf32, #tpu.memory_space<vmem>>, %arg5: memref<1x64xf32, #tpu.memory_space<vmem>>, %arg6: memref<1x64xf32, #tpu.memory_space<vmem>>, %arg7: memref<1x1xf32, #tpu.memory_space<vmem>>, %arg8: memref<128x128xf32, #tpu.memory_space<vmem>>, %arg9: memref<1x128xf32, #tpu.memory_space<vmem>>, %arg10: memref<1x128xf32, #tpu.memory_space<vmem>>, %arg11: memref<1x1xf32, #tpu.memory_space<vmem>>, %arg12: memref<1x1xf32, #tpu.memory_space<vmem>>, %arg13: memref<1x128xf32, #tpu.memory_space<vmem>>) attributes {dimension_semantics = [#tpu.dimension_semantics<arbitrary>], iteration_bounds = array<i64: 1>, scalar_prefetch = 0 : i64, scratch_operands = 3 : i64, tpu.core_type = #tpu.core_type<tc>, window_params = [{transform_indices = @transform_0, window_bounds = array<i64: 16, 1024>}, {pipeline_mode = #tpu.pipeline_mode<synchronous>, transform_indices = @transform_1, window_bounds = array<i64: 1024, 128>}, {pipeline_mode = #tpu.pipeline_mode<synchronous>, transform_indices = @transform_2, window_bounds = array<i64: 1, 128>}, {pipeline_mode = #tpu.pipeline_mode<synchronous>, transform_indices = @transform_3, window_bounds = array<i64: 128, 64>}, {pipeline_mode = #tpu.pipeline_mode<synchronous>, transform_indices = @transform_4, window_bounds = array<i64: 1, 64>}, {pipeline_mode = #tpu.pipeline_mode<synchronous>, transform_indices = @transform_5, window_bounds = array<i64: 1, 64>}, {pipeline_mode = #tpu.pipeline_mode<synchronous>, transform_indices = @transform_6, window_bounds = array<i64: 1, 1>}, {pipeline_mode = #tpu.pipeline_mode<synchronous>, transform_indices = @transform_7, window_bounds = array<i64: 128, 128>}, {pipeline_mode = #tpu.pipeline_mode<synchronous>, transform_indices = @transform_8, window_bounds = array<i64: 1, 128>}, {pipeline_mode = #tpu.pipeline_mode<synchronous>, transform_indices = @transform_9, window_bounds = array<i64: 1, 128>}]} {
    %c0_i32 = arith.constant 0 : i32
    %0 = arith.cmpi eq, %arg0, %c0_i32 : i32
    %1 = arith.extui %0 : i1 to i32
    %c0_i32_0 = arith.constant 0 : i32
    %2 = arith.cmpi ne, %1, %c0_i32_0 : i32
    scf.if %2 {
      %cst_35 = arith.constant 0xFF800000 : f32
      %63 = vector.broadcast %cst_35 : f32 to vector<1x1xf32>
      %c0_36 = arith.constant 0 : index
      %c0_37 = arith.constant 0 : index
      %64 = vector.load %arg11[%c0_36, %c0_37] : memref<1x1xf32, #tpu.memory_space<vmem>>, vector<1x1xf32>
      tpu.vector_store %arg11[%c0_36, %c0_37], %63 {strides = array<i32>} : memref<1x1xf32, #tpu.memory_space<vmem>>, vector<1x1xf32>,
      %cst_38 = arith.constant 0.000000e+00 : f32
      %65 = vector.broadcast %cst_38 : f32 to vector<1x1xf32>
      %c0_39 = arith.constant 0 : index
      %c0_40 = arith.constant 0 : index
      %66 = vector.load %arg12[%c0_39, %c0_40] : memref<1x1xf32, #tpu.memory_space<vmem>>, vector<1x1xf32>
      tpu.vector_store %arg12[%c0_39, %c0_40], %65 {strides = array<i32>} : memref<1x1xf32, #tpu.memory_space<vmem>>, vector<1x1xf32>,
      %cst_41 = arith.constant 0.000000e+00 : f32
      %67 = vector.broadcast %cst_41 : f32 to vector<1x128xf32>
      %c0_42 = arith.constant 0 : index
      %c0_43 = arith.constant 0 : index
      %68 = vector.load %arg13[%c0_42, %c0_43] : memref<1x128xf32, #tpu.memory_space<vmem>>, vector<1x128xf32>
      tpu.vector_store %arg13[%c0_42, %c0_43], %67 {strides = array<i32>} : memref<1x128xf32, #tpu.memory_space<vmem>>, vector<1x128xf32>,
    } else {
    }
    %c0 = arith.constant 0 : index
    %c0_1 = arith.constant 0 : index
    %3 = vector.load %arg1[%c0, %c0_1] : memref<16x1024xbf16, #tpu.memory_space<vmem>>, vector<16x1024xbf16>
    %c0_2 = arith.constant 0 : index
    %c0_3 = arith.constant 0 : index
    %4 = vector.load %arg2[%c0_2, %c0_3] : memref<1024x128xbf16, #tpu.memory_space<vmem>>, vector<1024x128xbf16>
    %cst = arith.constant dense<0.000000e+00> : vector<16x128xf32>
    %5 = tpu.matmul %3, %4, %cst {dimension_numbers = #tpu.dot_dimension_numbers<[1], [0], [0], [1], [0, 0, 1, 1], [], []>} : vector<16x1024xbf16>, vector<1024x128xbf16>, vector<16x128xf32> -> vector<16x128xf32>
    %c0_4 = arith.constant 0 : index
    %c0_5 = arith.constant 0 : index
    %6 = vector.load %arg3[%c0_4, %c0_5] : memref<1x128xf32, #tpu.memory_space<vmem>>, vector<1x128xf32>
    %7 = vector.broadcast %6 : vector<1x128xf32> to vector<16x128xf32>
    %8 = arith.addf %5, %7 : vector<16x128xf32>
    %c0_6 = arith.constant 0 : index
    %c0_7 = arith.constant 0 : index
    %9 = vector.load %arg4[%c0_6, %c0_7] : memref<128x64xf32, #tpu.memory_space<vmem>>, vector<128x64xf32>
    %cst_8 = arith.constant dense<0.000000e+00> : vector<16x64xf32>
    %10 = tpu.matmul %8, %9, %cst_8 {dimension_numbers = #tpu.dot_dimension_numbers<[1], [0], [0], [1], [0, 0, 1, 1], [], []>} : vector<16x128xf32>, vector<128x64xf32>, vector<16x64xf32> -> vector<16x64xf32>
    %c0_9 = arith.constant 0 : index
    %c0_10 = arith.constant 0 : index
    %11 = vector.load %arg5[%c0_9, %c0_10] : memref<1x64xf32, #tpu.memory_space<vmem>>, vector<1x64xf32>
    %12 = vector.broadcast %11 : vector<1x64xf32> to vector<16x64xf32>
    %13 = arith.addf %10, %12 : vector<16x64xf32>
    %14 = math.tanh %13 : vector<16x64xf32>
    %c0_11 = arith.constant 0 : index
    %c0_12 = arith.constant 0 : index
    %15 = vector.load %arg6[%c0_11, %c0_12] : memref<1x64xf32, #tpu.memory_space<vmem>>, vector<1x64xf32>
    %16 = vector.broadcast %15 : vector<1x64xf32> to vector<16x64xf32>
    %17 = arith.mulf %14, %16 : vector<16x64xf32>
    %cst_13 = arith.constant dense<0.000000e+00> : vector<16xf32>
    %18 = vector.multi_reduction <add>, %17, %cst_13 [1] : vector<16x64xf32> to vector<16xf32>
    %19 = vector.shape_cast %18 : vector<16xf32> to vector<16x1xf32>
    %c0_14 = arith.constant 0 : index
    %c0_15 = arith.constant 0 : index
    %20 = vector.load %arg7[%c0_14, %c0_15] : memref<1x1xf32, #tpu.memory_space<vmem>>, vector<1x1xf32>
    %21 = vector.broadcast %20 : vector<1x1xf32> to vector<16x1xf32>
    %22 = arith.addf %19, %21 : vector<16x1xf32>
    %23 = tpu.iota {dimensions = array<i32: 0>} : vector<16x1xi32>
    %c16_i32 = arith.constant 16 : i32
    %24 = arith.muli %arg0, %c16_i32 : i32
    %25 = vector.broadcast %24 : i32 to vector<16x1xi32>
    %26 = arith.addi %23, %25 : vector<16x1xi32>
    %c8_i32 = arith.constant 8 : i32
    %27 = vector.broadcast %c8_i32 : i32 to vector<16x1xi32>
    %28 = arith.cmpi slt, %26, %27 : vector<16x1xi32>
    %cst_16 = arith.constant 0xFF800000 : f32
    %29 = vector.broadcast %cst_16 : f32 to vector<16x1xf32>
    %30 = arith.select %28, %22, %29 : vector<16x1xi1>, vector<16x1xf32>
    %cst_17 = arith.constant 0.000000e+00 : f32
    %31 = vector.shape_cast %28 : vector<16x1xi1> to vector<16x1xi1>
    %32 = vector.broadcast %31 : vector<16x1xi1> to vector<16x128xi1>
    %33 = vector.broadcast %cst_17 : f32 to vector<16x128xf32>
    %34 = arith.select %32, %8, %33 : vector<16x128xi1>, vector<16x128xf32>
    %c0_18 = arith.constant 0 : index
    %c0_19 = arith.constant 0 : index
    %35 = vector.load %arg11[%c0_18, %c0_19] : memref<1x1xf32, #tpu.memory_space<vmem>>, vector<1x1xf32>
    %cst_20 = arith.constant dense<0xFF800000> : vector<1xf32>
    %36 = vector.multi_reduction <maximumf>, %30, %cst_20 [0] : vector<16x1xf32> to vector<1xf32>
    %37 = vector.shape_cast %36 : vector<1xf32> to vector<1x1xf32>
    %38 = arith.maximumf %35, %37 : vector<1x1xf32>
    %39 = arith.subf %35, %38 : vector<1x1xf32>
    %40 = math.exp %39 : vector<1x1xf32>
    %41 = vector.broadcast %38 : vector<1x1xf32> to vector<16x1xf32>
    %42 = arith.subf %30, %41 : vector<16x1xf32>
    %43 = math.exp %42 : vector<16x1xf32>
    %c0_21 = arith.constant 0 : index
    %c0_22 = arith.constant 0 : index
    %44 = vector.load %arg12[%c0_21, %c0_22] : memref<1x1xf32, #tpu.memory_space<vmem>>, vector<1x1xf32>
    %45 = arith.mulf %40, %44 : vector<1x1xf32>
    %cst_23 = arith.constant dense<0.000000e+00> : vector<1xf32>
    %46 = vector.multi_reduction <add>, %43, %cst_23 [0] : vector<16x1xf32> to vector<1xf32>
    %47 = vector.shape_cast %46 : vector<1xf32> to vector<1x1xf32>
    %48 = arith.addf %45, %47 : vector<1x1xf32>
    %c0_24 = arith.constant 0 : index
    %c0_25 = arith.constant 0 : index
    %49 = vector.load %arg12[%c0_24, %c0_25] : memref<1x1xf32, #tpu.memory_space<vmem>>, vector<1x1xf32>
    tpu.vector_store %arg12[%c0_24, %c0_25], %48 {strides = array<i32>} : memref<1x1xf32, #tpu.memory_space<vmem>>, vector<1x1xf32>,
    %c0_26 = arith.constant 0 : index
    %c0_27 = arith.constant 0 : index
    %50 = vector.load %arg13[%c0_26, %c0_27] : memref<1x128xf32, #tpu.memory_space<vmem>>, vector<1x128xf32>
    %51 = vector.broadcast %40 : vector<1x1xf32> to vector<1x128xf32>
    %52 = arith.mulf %51, %50 : vector<1x128xf32>
    %53 = vector.broadcast %43 : vector<16x1xf32> to vector<16x128xf32>
    %54 = arith.mulf %53, %34 : vector<16x128xf32>
    %cst_28 = arith.constant dense<0.000000e+00> : vector<128xf32>
    %55 = vector.multi_reduction <add>, %54, %cst_28 [0] : vector<16x128xf32> to vector<128xf32>
    %56 = vector.shape_cast %55 : vector<128xf32> to vector<1x128xf32>
    %57 = arith.addf %52, %56 : vector<1x128xf32>
    %c0_29 = arith.constant 0 : index
    %c0_30 = arith.constant 0 : index
    %58 = vector.load %arg13[%c0_29, %c0_30] : memref<1x128xf32, #tpu.memory_space<vmem>>, vector<1x128xf32>
    tpu.vector_store %arg13[%c0_29, %c0_30], %57 {strides = array<i32>} : memref<1x128xf32, #tpu.memory_space<vmem>>, vector<1x128xf32>,
    %c0_31 = arith.constant 0 : index
    %c0_32 = arith.constant 0 : index
    %59 = vector.load %arg11[%c0_31, %c0_32] : memref<1x1xf32, #tpu.memory_space<vmem>>, vector<1x1xf32>
    tpu.vector_store %arg11[%c0_31, %c0_32], %38 {strides = array<i32>} : memref<1x1xf32, #tpu.memory_space<vmem>>, vector<1x1xf32>,
    %c0_i32_33 = arith.constant 0 : i32
    %60 = arith.cmpi eq, %arg0, %c0_i32_33 : i32
    %61 = arith.extui %60 : i1 to i32
    %c0_i32_34 = arith.constant 0 : i32
    %62 = arith.cmpi ne, %61, %c0_i32_34 : i32
    scf.if %62 {
      %c0_35 = arith.constant 0 : index
      %c0_36 = arith.constant 0 : index
      %63 = vector.load %arg13[%c0_35, %c0_36] : memref<1x128xf32, #tpu.memory_space<vmem>>, vector<1x128xf32>
      %c0_37 = arith.constant 0 : index
      %c0_38 = arith.constant 0 : index
      %64 = vector.load %arg12[%c0_37, %c0_38] : memref<1x1xf32, #tpu.memory_space<vmem>>, vector<1x1xf32>
      %65 = vector.broadcast %64 : vector<1x1xf32> to vector<1x128xf32>
      %66 = arith.divf %63, %65 : vector<1x128xf32>
      %c0_39 = arith.constant 0 : index
      %c0_40 = arith.constant 0 : index
      %67 = vector.load %arg8[%c0_39, %c0_40] : memref<128x128xf32, #tpu.memory_space<vmem>>, vector<128x128xf32>
      %cst_41 = arith.constant dense<0.000000e+00> : vector<1x128xf32>
      %68 = tpu.matmul %66, %67, %cst_41 {dimension_numbers = #tpu.dot_dimension_numbers<[1], [0], [0], [1], [0, 0, 1, 1], [], []>} : vector<1x128xf32>, vector<128x128xf32>, vector<1x128xf32> -> vector<1x128xf32>
      %c0_42 = arith.constant 0 : index
      %c0_43 = arith.constant 0 : index
      %69 = vector.load %arg9[%c0_42, %c0_43] : memref<1x128xf32, #tpu.memory_space<vmem>>, vector<1x128xf32>
      %70 = arith.addf %68, %69 : vector<1x128xf32>
      %c0_44 = arith.constant 0 : index
      %c0_45 = arith.constant 0 : index
      %71 = vector.load %arg10[%c0_44, %c0_45] : memref<1x128xf32, #tpu.memory_space<vmem>>, vector<1x128xf32>
      tpu.vector_store %arg10[%c0_44, %c0_45], %70 {strides = array<i32>} : memref<1x128xf32, #tpu.memory_space<vmem>>, vector<1x128xf32>,
    } else {
    }
    return
  }
  func.func @transform_0(%arg0: i32) -> (i32, i32) {
    %c0_i32 = arith.constant 0 : i32
    %c0_i32_0 = arith.constant 0 : i32
    return %arg0, %c0_i32 : i32, i32
  }
  func.func @transform_1(%arg0: i32) -> (i32, i32) {
    %c0_i32 = arith.constant 0 : i32
    %c0_i32_0 = arith.constant 0 : i32
    %c0_i32_1 = arith.constant 0 : i32
    return %c0_i32, %c0_i32_0 : i32, i32
  }
  func.func @transform_2(%arg0: i32) -> (i32, i32) {
    %c0_i32 = arith.constant 0 : i32
    %c0_i32_0 = arith.constant 0 : i32
    %c0_i32_1 = arith.constant 0 : i32
    return %c0_i32, %c0_i32_0 : i32, i32
  }
  func.func @transform_3(%arg0: i32) -> (i32, i32) {
    %c0_i32 = arith.constant 0 : i32
    %c0_i32_0 = arith.constant 0 : i32
    %c0_i32_1 = arith.constant 0 : i32
    return %c0_i32, %c0_i32_0 : i32, i32
  }
  func.func @transform_4(%arg0: i32) -> (i32, i32) {
    %c0_i32 = arith.constant 0 : i32
    %c0_i32_0 = arith.constant 0 : i32
    %c0_i32_1 = arith.constant 0 : i32
    return %c0_i32, %c0_i32_0 : i32, i32
  }
  func.func @transform_5(%arg0: i32) -> (i32, i32) {
    %c0_i32 = arith.constant 0 : i32
    %c0_i32_0 = arith.constant 0 : i32
    %c0_i32_1 = arith.constant 0 : i32
    return %c0_i32, %c0_i32_0 : i32, i32
  }
  func.func @transform_6(%arg0: i32) -> (i32, i32) {
    %c0_i32 = arith.constant 0 : i32
    %c0_i32_0 = arith.constant 0 : i32
    %c0_i32_1 = arith.constant 0 : i32
    return %c0_i32, %c0_i32_0 : i32, i32
  }
  func.func @transform_7(%arg0: i32) -> (i32, i32) {
    %c0_i32 = arith.constant 0 : i32
    %c0_i32_0 = arith.constant 0 : i32
    %c0_i32_1 = arith.constant 0 : i32
    return %c0_i32, %c0_i32_0 : i32, i32
  }
  func.func @transform_8(%arg0: i32) -> (i32, i32) {
    %c0_i32 = arith.constant 0 : i32
    %c0_i32_0 = arith.constant 0 : i32
    %c0_i32_1 = arith.constant 0 : i32
    return %c0_i32, %c0_i32_0 : i32, i32
  }
  func.func @transform_9(%arg0: i32) -> (i32, i32) {
    %c0_i32 = arith.constant 0 : i32
    %c0_i32_0 = arith.constant 0 : i32
    %c0_i32_1 = arith.constant 0 : i32
    return %c0_i32, %c0_i32_0 : i32, i32
  }
}

</mosaic_0001>

<bundles_post_ra>
// kernel: tpu_custom_call.1
= control target key start
LH: loop header
LB: loop body
LE: loop exit
PB: predicated region body
PF: predicated region fallthrough
CT: control target
= control target key end

     0   :  { %s1819_s0 = inlined_call_operand.vmem [shape: bf16[8,1024], index: 0, kind: input, shape index: {}]   ;;  %s1820_s1 = inlined_call_operand.hbm [shape: bf16[1024,128], index: 1, kind: input, shape index: {}]   ;;  %s1821_s2 = inlined_call_operand.vmem [shape: f32[1,128], index: 2, kind: input, shape index: {}]   ;;  %s1822_s3 = inlined_call_operand.vmem [shape: f32[128,64], index: 3, kind: input, shape index: {}]   ;;  %s1823_s4 = inlined_call_operand.vmem [shape: f32[1,64], index: 4, kind: input, shape index: {}]   ;;  %s1824_s5 = inlined_call_operand.vmem [shape: f32[1,64], index: 5, kind: input, shape index: {}]   ;;  %s1825_s6 = inlined_call_operand.<no memory space> [shape: f32[1,1], index: 6, kind: input, shape index: {}]   ;;  %s1826_s7 = inlined_call_operand.vmem [shape: f32[128,128], index: 7, kind: input, shape index: {}]   ;;  %s1827_s8 = inlined_call_operand.vmem [shape: f32[1,128], index: 8, kind: input, shape index: {}]   ;;  %s1828_s9 = inlined_call_operand.hbm [shape: f32[1,128], index: 9, kind: output, shape index: {}]  }
   0x1   :  { %v14_v0 = vstv %s1825_s6 }
   0x2   :  { %15 = vst [vmem:[#allocation5] sm:$0x1] %v14_v0 }
   0x3   :  { %16 = vsyncpa [#allocation7], 0 }
   0x4   :  { %17 = vsyncpa [#allocation8], 0  ;;  %s1582_s11 = smov [#allocation6]   ;;  %s1534_s15 = scalar_lea.hbm %s1820_s1, 8192 }
   0x5   :  { %s25_s12 = sshll.u32 %s1582_s11, 4  ;;  %p1535_p0 = scmp.ne.s32.totalorder %s1820_s1, %s1534_s15  ;;  %s26_s12 = int_to_ptr.vmem [resolvable:$true] %s25_s12 }
   0x6   :  { %p1538_p1 = scmp.lt.u32.totalorder %s1534_s15, %s1820_s1 }
   0x8   :  { %p1540_p2 = pnand %p1538_p1, %p1535_p0 }
   0xa   :  { %1543 = shalt.err (!%p1540_p2)
}
   0xb   :  { %s1544_s6 = scalar_lea.vmem %s26_s12, 8192  ;;  %p1549_p4 = scmp.lt.s32.totalorder %s26_s12, %s26_s12 }
   0xc   :  { %p1545_p3 = scmp.ne.s32.totalorder %s26_s12, %s1544_s6  ;;  %p1550_p5 = scmp.lt.s32.totalorder %s1544_s6, %s1544_s6 }
   0xe   :  { %p1551_p6 = por %p1550_p5, %p1549_p4 }
  0x10   :  { %p1552_p7 = pnand %p1551_p6, %p1545_p3 }
  0x12   :  { %1555 = shalt.err (!%p1552_p7)
}
  0x13   :  { %s1583_s20 = smov 64   ;;  %s1584_s21 = smov 4  }
  0x14   :  { %31 = dma.hbm_to_vmem [thread:$0]  %s1820_s1, 8192, %s26_s12, [#allocation7], %s1583_s20, %s1583_s20, %s1584_s21  }
  0x15   :  { %1578 = dma.done.wait [#allocation7], 8192  }
  0x16   :  { %1579 = vsyncadd [#allocation7], 4294959104  ;;  %v1460_v1 = vld [vmem:[#allocation6 + $0x40] sm:$0xff]   ;;  %v1464_v5 = vld [vmem:[#allocation6 + $0x48] sm:$0xff]   ;;  %vm54_vm0 = vcmask 0   ;;  %vm898_vm1 = vcmask 523264  }
  0x17   :  { %v1461_v2 = vld [vmem:[#allocation6 + $0xc0] sm:$0xff]   ;;  %1200 = vmatprep.subr.bf16.mxu0 %v1460_v1  ;;  %v1465_v6 = vld [vmem:[#allocation6 + $0xc8] sm:$0xff]   ;;  %v1468_v9 = vld [vmem:[#allocation6 + $0x50] sm:$0xff]   ;;  %vm932_vm2 = vcmask 7168   ;;  %vm1589_vm3 = vmmov 0   ;;  %s1590_s30 = smov [#allocation9]  }
  0x18   :  { %v1462_v3 = vld [vmem:[#allocation6] sm:$0xff]   ;;  %1222 = vmatprep.subr.bf16.mxu1 %v1461_v2  ;;  %v1466_v7 = vld [vmem:[#allocation6 + $0x8] sm:$0xff]   ;;  %v1469_v10 = vld [vmem:[#allocation6 + $0xd0] sm:$0xff]   ;;  %s1115_s10 = sshll.u32 %s1590_s30, 4  ;;  %s1116_s10 = int_to_ptr.vmem [resolvable:$true] %s1115_s10 }
  0x19   :  { %v1463_v4 = vld [vmem:[#allocation6 + $0x80] sm:$0xff]   ;;  %1201 = vmatpush3.bf16.msra.mxu0 %v1462_v3  ;;  %v1467_v8 = vld [vmem:[#allocation6 + $0x88] sm:$0xff]   ;;  %v1470_v11 = vld [vmem:[#allocation6 + $0x10] sm:$0xff]   ;;  %s1556_s11 = scalar_lea.vmem %s1116_s10, 16  ;;  %s1560_s12 = scalar_lea.vmem %s1116_s10, 32 }
  0x1a   :  { %1223 = vmatpush3.bf16.msra.mxu1 %v1463_v4  ;;  %1202 = vmatprep.subr.bf16.mxu0 %v1464_v5  ;;  %v1471_v12 = vld [vmem:[#allocation6 + $0x90] sm:$0xff]   ;;  %v1472_v13 = vld [vmem:[#allocation6 + $0x58] sm:$0xff]   ;;  %v1476_v17 = vld [vmem:[#allocation6 + $0x60] sm:$0xff]   ;;  %p1557_p8 = scmp.ne.s32.totalorder %s1116_s10, %s1556_s11  ;;  %p1561_p9 = scmp.lt.s32.totalorder %s1116_s10, %s1116_s10 }
  0x1b   :  { %1224 = vmatprep.subr.bf16.mxu1 %v1465_v6  ;;  %v1473_v14 = vld [vmem:[#allocation6 + $0xd8] sm:$0xff]   ;;  %v1477_v18 = vld [vmem:[#allocation6 + $0xe0] sm:$0xff]   ;;  %v1480_v21 = vld [vmem:[#allocation6 + $0x68] sm:$0xff]   ;;  %p1562_p10 = scmp.lt.s32.totalorder %s1560_s12, %s1556_s11 }
  0x1c   :  { %v1474_v15 = vld [vmem:[#allocation6 + $0x18] sm:$0xff]   ;;  %v1478_v19 = vld [vmem:[#allocation6 + $0x20] sm:$0xff]   ;;  %v1481_v22 = vld [vmem:[#allocation6 + $0xe8] sm:$0xff]  }
  0x1d   :  { %1203 = vmatpush3.bf16.msra.mxu0 %v1466_v7  ;;  %v1475_v16 = vld [vmem:[#allocation6 + $0x98] sm:$0xff]   ;;  %v1479_v20 = vld [vmem:[#allocation6 + $0xa0] sm:$0xff]   ;;  %v1482_v23 = vld [vmem:[#allocation6 + $0x28] sm:$0xff]   ;;  %p1563_p11 = por %p1562_p10, %p1561_p9 }
  0x1e   :  { %1225 = vmatpush3.bf16.msra.mxu1 %v1467_v8  ;;  %1204 = vmatprep.subr.bf16.mxu0 %v1468_v9  ;;  %v1483_v24 = vld [vmem:[#allocation6 + $0xa8] sm:$0xff]   ;;  %v1484_v25 = vld [vmem:[#allocation6 + $0x70] sm:$0xff]   ;;  %v1488_v29 = vld [vmem:[#allocation6 + $0x78] sm:$0xff]  }
  0x1f   :  { %1226 = vmatprep.subr.bf16.mxu1 %v1469_v10  ;;  %v1485_v26 = vld [vmem:[#allocation6 + $0xf0] sm:$0xff]   ;;  %v1489_v30 = vld [vmem:[#allocation6 + $0xf8] sm:$0xff]   ;;  %v59_v35 = vld [vmem:[%s1819_s0 + $0x8] sm:$0xff]  ;;  %p1564_p12 = pnand %p1563_p11, %p1557_p8 }
  0x20   :  { %v1486_v27 = vld [vmem:[#allocation6 + $0x30] sm:$0xff]   ;;  %v1490_v31 = vld [vmem:[#allocation6 + $0x38] sm:$0xff]   ;;  %v63_v38 = vld [vmem:[%s1819_s0 + $0x28] sm:$0xff] }
  0x21   :  { %1205 = vmatpush3.bf16.msra.mxu0 %v1470_v11  ;;  %v1487_v28 = vld [vmem:[#allocation6 + $0xb0] sm:$0xff]   ;;  %v1491_v32 = vld [vmem:[#allocation6 + $0xb8] sm:$0xff]   ;;  %v1127_v39 = vcombine.low %v59_v35, %v63_v38  ;;  %v1128_v40 = vcombine.high %v59_v35, %v63_v38  ;;  %v1492_v41 = vld [vmem:[#allocation6 + $0x140] sm:$0xff]  }
  0x22   :  { %1227 = vmatpush3.bf16.msra.mxu1 %v1471_v12  ;;  %1206 = vmatprep.subr.bf16.mxu0 %v1472_v13  ;;  %v58_v33 = vld [vmem:[%s1819_s0] sm:$0xff]  ;;  %v1496_v45 = vld [vmem:[#allocation6 + $0x148] sm:$0xff]   ;;  %v1500_v49 = vld [vmem:[#allocation6 + $0x150] sm:$0xff]  }
  0x23   :  { %1228 = vmatprep.subr.bf16.mxu1 %v1473_v14  ;;  %v62_v34 = vld [vmem:[%s1819_s0 + $0x20] sm:$0xff]  ;;  %698 = vmatprep.mubr.bf16.mxu1 %v1128_v40  ;;  %v1497_v46 = vld [vmem:[#allocation6 + $0x1c8] sm:$0xff]   ;;  %v1501_v50 = vld [vmem:[#allocation6 + $0x1d0] sm:$0xff]  }
  0x24   :  { %v1125_v36 = vcombine.low %v58_v33, %v62_v34  ;;  %v1126_v37 = vcombine.high %v58_v33, %v62_v34  ;;  %v1493_v42 = vld [vmem:[#allocation6 + $0x1c0] sm:$0xff]   ;;  %v1498_v47 = vld [vmem:[#allocation6 + $0x108] sm:$0xff]   ;;  %v1502_v51 = vld [vmem:[#allocation6 + $0x110] sm:$0xff]  }
  0x25   :  { %1207 = vmatpush3.bf16.msra.mxu0 %v1474_v15  ;;  %v1494_v43 = vld [vmem:[#allocation6 + $0x100] sm:$0xff]   ;;  %v1499_v48 = vld [vmem:[#allocation6 + $0x188] sm:$0xff]   ;;  %v1503_v52 = vld [vmem:[#allocation6 + $0x190] sm:$0xff]  }
  0x26   :  { %1229 = vmatpush3.bf16.msra.mxu1 %v1475_v16  ;;  %1208 = vmatprep.subr.bf16.mxu0 %v1476_v17  ;;  %v1495_v44 = vld [vmem:[#allocation6 + $0x180] sm:$0xff]   ;;  %v1504_v53 = vld [vmem:[#allocation6 + $0x158] sm:$0xff]   ;;  %v1512_v61 = vld [vmem:[#allocation6 + $0x168] sm:$0xff]  }
  0x27   :  { %1230 = vmatprep.subr.bf16.mxu1 %v1477_v18  ;;  %657 = vmatprep.mubr.bf16.mxu0 %v1126_v37  ;;  %v1505_v54 = vld [vmem:[#allocation6 + $0x1d8] sm:$0xff]   ;;  %v1508_v57 = vld [vmem:[#allocation6 + $0x160] sm:$0xff]   ;;  %v1513_v62 = vld [vmem:[#allocation6 + $0x1e8] sm:$0xff]  }
  0x28   :  { %v1506_v55 = vld [vmem:[#allocation6 + $0x118] sm:$0xff]   ;;  %v1509_v58 = vld [vmem:[#allocation6 + $0x1e0] sm:$0xff]   ;;  %v1514_v63 = vld [vmem:[#allocation6 + $0x128] sm:$0xff]  }
  0x29   :  { %1209 = vmatpush3.bf16.msra.mxu0 %v1478_v19  ;;  %v1507_v56 = vld [vmem:[#allocation6 + $0x198] sm:$0xff]   ;;  %v1510_v59 = vld [vmem:[#allocation6 + $0x120] sm:$0xff]   ;;  %v1515_v0 = vld [vmem:[#allocation6 + $0x1a8] sm:$0xff]  }
  0x2a   :  { %1231 = vmatpush3.bf16.msra.mxu1 %v1479_v20  ;;  %1210 = vmatprep.subr.bf16.mxu0 %v1480_v21  ;;  %v1511_v60 = vld [vmem:[#allocation6 + $0x1a0] sm:$0xff]   ;;  %v1516_v1 = vld [vmem:[#allocation6 + $0x170] sm:$0xff]   ;;  %v1520_v5 = vld [vmem:[#allocation6 + $0x178] sm:$0xff]  }
  0x2b   :  { %1232 = vmatprep.subr.bf16.mxu1 %v1481_v22  ;;  %v1517_v2 = vld [vmem:[#allocation6 + $0x1f0] sm:$0xff]   ;;  %v1521_v6 = vld [vmem:[#allocation6 + $0x1f8] sm:$0xff]   ;;  %v790_v18 = vld [vmem:[%s1822_s3 + $0x8] sm:$0xff] }
  0x2c   :  { %v1518_v3 = vld [vmem:[#allocation6 + $0x130] sm:$0xff]   ;;  %v1522_v7 = vld [vmem:[#allocation6 + $0x138] sm:$0xff]  }
  0x2d   :  { %1211 = vmatpush3.bf16.msra.mxu0 %v1482_v23  ;;  %v1519_v4 = vld [vmem:[#allocation6 + $0x1b0] sm:$0xff]   ;;  %v1523_v8 = vld [vmem:[#allocation6 + $0x1b8] sm:$0xff]  }
  0x2e   :  { %1233 = vmatpush3.bf16.msra.mxu1 %v1483_v24  ;;  %1212 = vmatprep.subr.bf16.mxu0 %v1484_v25  ;;  %v60_v9 = vld [vmem:[%s1819_s0 + $0x10] sm:$0xff]  ;;  %v61_v13 = vld [vmem:[%s1819_s0 + $0x18] sm:$0xff]  ;;  %v789_v17 = vld [vmem:[%s1822_s3] sm:$0xff] }
  0x2f   :  { %1234 = vmatprep.subr.bf16.mxu1 %v1485_v26  ;;  %v64_v10 = vld [vmem:[%s1819_s0 + $0x30] sm:$0xff]  ;;  %v65_v14 = vld [vmem:[%s1819_s0 + $0x38] sm:$0xff]  ;;  %v1393_v20 = vpack.c.bf16 %v790_v18, %v789_v17  ;;  %v793_v23 = vld [vmem:[%s1822_s3 + $0x20] sm:$0xff] }
  0x30   :  { %v1129_v11 = vcombine.low %v60_v9, %v64_v10  ;;  %v1130_v12 = vcombine.high %v60_v9, %v64_v10  ;;  %v1131_v15 = vcombine.low %v61_v13, %v65_v14  ;;  %v1132_v16 = vcombine.high %v61_v13, %v65_v14  ;;  %v791_v19 = vld [vmem:[%s1822_s3 + $0x10] sm:$0xff]  ;;  %v792_v21 = vld [vmem:[%s1822_s3 + $0x18] sm:$0xff]  ;;  %v794_v24 = vld [vmem:[%s1822_s3 + $0x28] sm:$0xff] }
  0x31   :  { %1213 = vmatpush3.bf16.msra.mxu0 %v1486_v27  ;;  %v1397_v22 = vpack.c.bf16 %v792_v21, %v791_v19  ;;  %v1401_v25 = vpack.c.bf16 %v794_v24, %v793_v23  ;;  %v795_v26 = vld [vmem:[%s1822_s3 + $0x30] sm:$0xff]  ;;  %v796_v27 = vld [vmem:[%s1822_s3 + $0x38] sm:$0xff]  ;;  %v801_v35 = vld [vmem:[%s1822_s3 + $0x60] sm:$0xff]  ;;  %v1585_v10 = vmov -inf  }
  0x32   :  { %1235 = vmatpush3.bf16.msra.mxu1 %v1487_v28  ;;  %1214 = vmatprep.subr.bf16.mxu0 %v1488_v29  ;;  %v1405_v28 = vpack.c.bf16 %v796_v27, %v795_v26  ;;  %v797_v29 = vld [vmem:[%s1822_s3 + $0x40] sm:$0xff]  ;;  %v800_v33 = vld [vmem:[%s1822_s3 + $0x58] sm:$0xff]  ;;  %v803_v38 = vld [vmem:[%s1822_s3 + $0x70] sm:$0xff]  ;;  %55 = vst.msk [vmem:[#allocation2] sm:$0x1] %vm54_vm0, %v1585_v10  ;;  %v947_v26 = vlaneseq }
  0x33   :  { %1236 = vmatprep.subr.bf16.mxu1 %v1489_v30  ;;  %v798_v30 = vld [vmem:[%s1822_s3 + $0x48] sm:$0xff]  ;;  %v1199_v21 = vld [vmem:[#allocation5] ss:$0 sm:$0xff] }
  0x35   :  { %1215 = vmatpush3.bf16.msra.mxu0 %v1490_v31  ;;  %v1409_v31 = vpack.c.bf16 %v798_v30, %v797_v29  ;;  %v948_v29 = vshrl.u32 %v947_v26, 7 }
  0x36   :  { %1237 = vmatpush3.bf16.msra.mxu1 %v1491_v32  ;;  %1244 = vmatprep.subr.bf16.mxu0 %v1492_v41  ;;  %v799_v32 = vld [vmem:[%s1822_s3 + $0x50] sm:$0xff] }
  0x37   :  { %1266 = vmatprep.subr.bf16.mxu1 %v1493_v42  ;;  %v1413_v34 = vpack.c.bf16 %v800_v33, %v799_v32  ;;  %v1745_v33 = vsub.s32 0, %v948_v29 }
  0x38   :  { %658 = vmatmul.mubr.bf16.vlgmr.msra.gmra.mrb[0].mxu0 %v1125_v36  ;;  %v802_v36 = vld [vmem:[%s1822_s3 + $0x68] sm:$0xff] }
  0x39   :  { %699 = vmatmul.mubr.bf16.vlgmr.msra.gmra.mrb[0].mxu1 %v1127_v39  ;;  %1245 = vmatpush3.bf16.msra.mxu0 %v1494_v43  ;;  %v1417_v37 = vpack.c.bf16 %v802_v36, %v801_v35  ;;  %v804_v39 = vld [vmem:[%s1822_s3 + $0x78] sm:$0xff]  ;;  %v1124_v43 = vld [vmem:[%s1821_s2] ss:$0 sm:$0xff] }
  0x3a   :  { %1267 = vmatpush3.bf16.msra.mxu1 %v1495_v44  ;;  %1246 = vmatprep.subr.bf16.mxu0 %v1496_v45  ;;  %v1421_v40 = vpack.c.bf16 %v804_v39, %v803_v38  ;;  %v931_v32 = vld [vmem:[#allocation2] sm:$0x1] }
  0x3b   :  { %1268 = vmatprep.subr.bf16.mxu1 %v1497_v46  ;;  %739 = vmatprep.mubr.bf16.mxu0 %v1130_v12  ;;  %v1197_v12 = vld [vmem:[%s1823_s4] ss:$0 sm:$0xff] }
  0x3c   :  { %780 = vmatprep.mubr.bf16.mxu1 %v1132_v16  ;;  %v1198_v16 = vld [vmem:[%s1824_s5] ss:$0 sm:$0xff] }
  0x3d   :  { %1247 = vmatpush3.bf16.msra.mxu0 %v1498_v47 }
  0x3e   :  { %1269 = vmatpush3.bf16.msra.mxu1 %v1499_v48  ;;  %1248 = vmatprep.subr.bf16.mxu0 %v1500_v49 }
  0x3f   :  { %1270 = vmatprep.subr.bf16.mxu1 %v1501_v50 }
  0x41   :  { %1249 = vmatpush3.bf16.msra.mxu0 %v1502_v51 }
  0x42   :  { %1271 = vmatpush3.bf16.msra.mxu1 %v1503_v52  ;;  %1250 = vmatprep.subr.bf16.mxu0 %v1504_v53 }
  0x43   :  { %1272 = vmatprep.subr.bf16.mxu1 %v1505_v54 }
  0x45   :  { %1251 = vmatpush3.bf16.msra.mxu0 %v1506_v55 }
  0x46   :  { %1273 = vmatpush3.bf16.msra.mxu1 %v1507_v56  ;;  %1252 = vmatprep.subr.bf16.mxu0 %v1508_v57 }
  0x47   :  { %1274 = vmatprep.subr.bf16.mxu1 %v1509_v58 }
  0x49   :  { %1253 = vmatpush3.bf16.msra.mxu0 %v1510_v59 }
  0x4a   :  { %1275 = vmatpush3.bf16.msra.mxu1 %v1511_v60  ;;  %1254 = vmatprep.subr.bf16.mxu0 %v1512_v61 }
  0x4b   :  { %1276 = vmatprep.subr.bf16.mxu1 %v1513_v62 }
  0x4d   :  { %1255 = vmatpush3.bf16.msra.mxu0 %v1514_v63 }
  0x4e   :  { %1277 = vmatpush3.bf16.msra.mxu1 %v1515_v0  ;;  %1256 = vmatprep.subr.bf16.mxu0 %v1516_v1 }
  0x4f   :  { %1278 = vmatprep.subr.bf16.mxu1 %v1517_v2 }
  0x51   :  { %1257 = vmatpush3.bf16.msra.mxu0 %v1518_v3 }
  0x52   :  { %1279 = vmatpush3.bf16.msra.mxu1 %v1519_v4  ;;  %1258 = vmatprep.subr.bf16.mxu0 %v1520_v5 }
  0x53   :  { %1280 = vmatprep.subr.bf16.mxu1 %v1521_v6 }
  0x55   :  { %1259 = vmatpush3.bf16.msra.mxu0 %v1522_v7 }
  0x56   :  { %1281 = vmatpush3.bf16.msra.mxu1 %v1523_v8  ;;  %1394 = vmatprep.subr.bf16.mxu0 %v1393_v20 }
  0x58   :  { %740 = vmatmul.mubr.bf16.vlgmr.msra.gmra.mrb[4].mxu0 %v1129_v11  ;;  %v1586_v11 = vmov 0.0  }
  0x59   :  { %781 = vmatmul.mubr.bf16.vlgmr.msra.gmra.mrb[4].mxu1 %v1131_v15  ;;  %1396 = vmatpush3.bf16.msra.mxu0 %v1393_v20  ;;  %56 = vst.msk [vmem:[#allocation3] sm:$0x1] %vm54_vm0, %v1586_v11  ;;  %57 = vst [vmem:[#allocation4] sm:$0x1] %v1586_v11  ;;  %v1587_v20 = vmov 0  }
  0x5a   :  { %1398 = vmatprep.subr.bf16.mxu0 %v1397_v22  ;;  %1459 = vset.pattern.permute.xlu1 %v1587_v20 }
  0x5b   :  { %1458 = vset.pattern.permute.xlu0 %v1587_v20  ;;  %1390 = vmatprep.mubr.msk.f32.mxu1 %vm1589_vm3, %v1586_v11  ;;  %v1036_v20 = vld [vmem:[%s1826_s7 + $0x78] sm:$0xff] }
  0x5d   :  { %1400 = vmatpush3.bf16.msra.mxu0 %v1397_v22 }
  0x5e   :  { %1402 = vmatprep.subr.bf16.mxu0 %v1401_v25 }
  0x61   :  { %1404 = vmatpush3.bf16.msra.mxu0 %v1401_v25 }
  0x62   :  { %1406 = vmatprep.subr.bf16.mxu0 %v1405_v28 }
  0x65   :  { %1408 = vmatpush3.bf16.msra.mxu0 %v1405_v28 }
  0x66   :  { %1410 = vmatprep.subr.bf16.mxu0 %v1409_v31 }
  0x69   :  { %1412 = vmatpush3.bf16.msra.mxu0 %v1409_v31 }
  0x6a   :  { %1414 = vmatprep.subr.bf16.mxu0 %v1413_v34 }
  0x6d   :  { %1416 = vmatpush3.bf16.msra.mxu0 %v1413_v34 }
  0x6e   :  { %1418 = vmatprep.subr.bf16.mxu0 %v1417_v37 }
  0x71   :  { %1420 = vmatpush3.bf16.msra.mxu0 %v1417_v37 }
  0x72   :  { %1422 = vmatprep.subr.bf16.mxu0 %v1421_v40 }
  0x75   :  { %1424 = vmatpush3.bf16.msra.mxu0 %v1421_v40 }
 0x10b   :  { %v1216_v41 = vpop.f32.mrb[0].mxu0 }
 0x10c   :  { %v1238_v42 = vpop.f32.mrb[0].mxu1  ;;  %v1217_v44 = vpop.f32.mrb[1].mxu0 }
 0x10d   :  { %v1218_v45 = vadd.f32 %v1217_v44, %v1216_v41  ;;  %v1239_v46 = vpop.f32.mrb[1].mxu1  ;;  %v1219_v47 = vpop.f32.mrb[2].mxu0 }
 0x10e   :  { %v1240_v48 = vadd.f32 %v1239_v46, %v1238_v42  ;;  %v1241_v49 = vpop.f32.mrb[2].mxu1  ;;  %v1220_v50 = vpop.f32.mrb[3].mxu0 }
 0x10f   :  { %v660_v51 = vadd.f32 %v1218_v45, %v1124_v43  ;;  %v1221_v52 = vadd.f32 %v1220_v50, %v1219_v47  ;;  %v1242_v53 = vpop.f32.mrb[3].mxu1 }
 0x110   :  { %v1243_v54 = vadd.f32 %v1242_v53, %v1241_v49 }
 0x111   :  { %v701_v55 = vadd.f32 %v1240_v48, %v660_v51  ;;  %v663_v56 = vadd.f32 %v1221_v52, %v1124_v43  ;;  %v1021_v51 = vld [vmem:[%s1826_s7] sm:$0xff]  ;;  %v1022_v52 = vld [vmem:[%s1826_s7 + $0x8] sm:$0xff] }
 0x113   :  { %v704_v57 = vadd.f32 %v1243_v54, %v663_v56  ;;  %v1426_v54 = vpack.c.bf16 %v1022_v52, %v1021_v51 }
 0x12b   :  { %v1260_v58 = vpop.f32.mrb[4].mxu0 }
 0x12c   :  { %v1282_v59 = vpop.f32.mrb[4].mxu1  ;;  %v1261_v60 = vpop.f32.mrb[5].mxu0 }
 0x12d   :  { %v1262_v61 = vadd.f32 %v1261_v60, %v1260_v58  ;;  %v1283_v62 = vpop.f32.mrb[5].mxu1  ;;  %v1263_v63 = vpop.f32.mrb[6].mxu0  ;;  %v1023_v58 = vld [vmem:[%s1826_s7 + $0x10] sm:$0xff] }
 0x12e   :  { %v1284_v0 = vadd.f32 %v1283_v62, %v1282_v59  ;;  %v1285_v1 = vpop.f32.mrb[6].mxu1  ;;  %v1264_v2 = vpop.f32.mrb[7].mxu0  ;;  %v1024_v59 = vld [vmem:[%s1826_s7 + $0x18] sm:$0xff] }
 0x12f   :  { %v742_v3 = vadd.f32 %v1262_v61, %v701_v55  ;;  %v1265_v4 = vadd.f32 %v1264_v2, %v1263_v63  ;;  %v1286_v5 = vpop.f32.mrb[7].mxu1  ;;  %v1588_v55 = vmov 0.0|0.0   ;;  %v1429_v61 = vpack.c.bf16 %v1024_v59, %v1023_v58 }
 0x130   :  { %v1287_v6 = vadd.f32 %v1286_v5, %v1285_v1  ;;  %1425 = vmatprep.subr.bf16.mxu1 %v1588_v55  ;;  %v1026_v1 = vld [vmem:[%s1826_s7 + $0x28] sm:$0xff]  ;;  %v1028_v5 = vld [vmem:[%s1826_s7 + $0x38] sm:$0xff] }
 0x131   :  { %v1731_v7 = vadd.f32 %v1284_v0, %v742_v3  ;;  %v745_v8 = vadd.f32 %v1265_v4, %v704_v57  ;;  %1427 = vmatpush3.bf16.msra.mxu1 %v1426_v54  ;;  %v958_v57 = vld [vmem:[#allocation3] sm:$0x1]  ;;  %v1027_v4 = vld [vmem:[%s1826_s7 + $0x30] sm:$0xff] }
 0x132   :  { %1428 = vmatprep.subr.bf16.mxu1 %v1588_v55  ;;  %v1025_v0 = vld [vmem:[%s1826_s7 + $0x20] sm:$0xff] }
 0x133   :  { %v786_v9 = vadd.f32 %v1287_v6, %v745_v8  ;;  %1355 = vmatprep.mubr.f32.mxu0 %v1731_v7  ;;  %v1432_v3 = vpack.c.bf16 %v1026_v1, %v1025_v0  ;;  %v1435_v6 = vpack.c.bf16 %v1028_v5, %v1027_v4  ;;  %v1029_v8 = vld [vmem:[%s1826_s7 + $0x40] sm:$0xff] }
 0x135   :  { %1356 = vmatmul.mubr.f32.vlgmr.msra.gmra.mrb[8].mxu0 %v786_v9  ;;  %1430 = vmatpush3.bf16.msra.mxu1 %v1429_v61  ;;  %v1030_v9 = vld [vmem:[%s1826_s7 + $0x48] sm:$0xff] }
 0x136   :  { %1431 = vmatprep.subr.bf16.mxu1 %v1588_v55  ;;  %v1438_v10 = vpack.c.bf16 %v1030_v9, %v1029_v8 }
 0x139   :  { %1433 = vmatpush3.bf16.msra.mxu1 %v1432_v3 }
 0x13a   :  { %1434 = vmatprep.subr.bf16.mxu1 %v1588_v55 }
 0x13d   :  { %1436 = vmatpush3.bf16.msra.mxu1 %v1435_v6 }
 0x13e   :  { %1437 = vmatprep.subr.bf16.mxu1 %v1588_v55 }
 0x141   :  { %1439 = vmatpush3.bf16.msra.mxu1 %v1438_v10 }
 0x142   :  { %1440 = vmatprep.subr.bf16.mxu1 %v1588_v55 }
 0x208   :  { %v1357_v13 = vpop.f32.mrb[8].mxu0 }
 0x209   :  { %v878_v14 = vpop.f32.mrb[9].mxu0  ;;  %v1031_v13 = vld [vmem:[%s1826_s7 + $0x50] sm:$0xff] }
 0x20a   :  { %v879_v15 = vadd.f32 %v1197_v12, %v878_v14  ;;  %v1032_v14 = vld [vmem:[%s1826_s7 + $0x58] sm:$0xff] }
 0x20c   :  { %1524 = vtanh.f32 %v879_v15  ;;  %v1441_v15 = vpack.c.bf16 %v1032_v14, %v1031_v13 }
 0x20e   :  { %1442 = vmatpush3.bf16.msra.mxu1 %v1441_v15 }
 0x20f   :  { %1443 = vmatprep.subr.bf16.mxu1 %v1588_v55 }
 0x216   :  { %v1525_v17 = vpop.eup %1524 }
 0x217   :  { %v896_v18 = vmul.f32 %v1525_v17, %v1198_v16  ;;  %v1033_v16 = vld [vmem:[%s1826_s7 + $0x60] sm:$0xff]  ;;  %v1034_v17 = vld [vmem:[%s1826_s7 + $0x68] sm:$0xff] }
 0x219   :  { %v899_v19 = vsel %vm898_vm1, %v896_v18, 0.0  ;;  %v1444_v18 = vpack.c.bf16 %v1034_v17, %v1033_v16 }
 0x21a   :  { %900 = vadd.xlane.f32.xlu0 %v899_v19  ;;  %v1035_v19 = vld [vmem:[%s1826_s7 + $0x70] sm:$0xff] }
 0x21b   :  { %1445 = vmatpush3.bf16.msra.mxu1 %v1444_v18 }
 0x21c   :  { %1446 = vmatprep.subr.bf16.mxu1 %v1588_v55 }
 0x2a7   :  { %v901_v22 = vpop.xlane.xlu0 %900 }
 0x2a8   :  { %v912_v23 = vadd.f32 %v1199_v21, %v901_v22  ;;  %v1447_v21 = vpack.c.bf16 %v1036_v20, %v1035_v19 }
 0x2aa   :  { %v933_v24 = vsel %vm932_vm2, %v912_v23, -inf  ;;  %1448 = vmatpush3.bf16.msra.mxu1 %v1447_v21 }
 0x2ab   :  { %v936_v25 = vrot.slane %v933_v24, 4 }
 0x2ad   :  { %v937_v27 = vmax.f32 %v933_v24, %v936_v25 }
 0x2af   :  { %v938_v28 = vrot.slane %v937_v27, 2 }
 0x2b1   :  { %v939_v30 = vmax.f32 %v937_v27, %v938_v28 }
 0x2b3   :  { %v940_v31 = vrot.slane %v939_v30, 1 }
 0x2b5   :  { %v941_v34 = vmax.f32 %v939_v30, %v940_v31 }
 0x2b7   :  { %v942_v35 = vmax.f32 %v931_v32, %v941_v34 }
 0x2b9   :  { %v950_v36 = vrot.slane %v942_v35, %v1745_v33  ;;  %1004 = vst.msk [vmem:[#allocation2] sm:$0x1] %vm54_vm0, %v942_v35  ;;  %v943_v39 = vsub.f32 %v931_v32, %v942_v35  ;;  %v972_v32 = vld [vmem:[#allocation4] sm:$0x1] }
 0x2bb   :  { %v952_v37 = vsub.f32 %v912_v23, %v950_v36  ;;  %v953_v38 = vsub.f32 -inf, %v950_v36  ;;  %v944_v42 = vmul.f32 1.442695, %v943_v39 }
 0x2bd   :  { %v954_v40 = vmul.f32 1.442695, %v952_v37  ;;  %v956_v41 = vmul.f32 1.442695, %v953_v38 }
 0x2bf   :  { %1526 = vpow2.f32 %v954_v40 }
 0x2c0   :  { %1528 = vpow2.f32 %v956_v41 }
 0x2c1   :  { %1530 = vpow2.f32 %v944_v42  ;;  %v1037_v42 = vld [vmem:[%s1827_s8] sm:$0x1] }
 0x2c9   :  { %v1527_v43 = vpop.eup %1526 }
 0x2ca   :  { %v1529_v44 = vpop.eup %1528  ;;  %v960_v45 = vsel %vm932_vm2, %v1527_v43, 0.0  ;;  %985 = vperm.xlu0 %1458, %v1527_v43  }
 0x2cb   :  { %v961_v46 = vsel %vm932_vm2, %v1529_v44, 0.0  ;;  %990 = vperm.xlu1 %1459, %v1529_v44   ;;  %v1531_v48 = vpop.eup %1530 }
 0x2cc   :  { %v962_v47 = vadd.f32 %v961_v46, %v960_v45  ;;  %v959_v62 = vmul.f32 %v1531_v48, %v958_v57 }
 0x2ce   :  { %v963_v49 = vrot.slane %v962_v47, 4 }
 0x2cf   :  { %975 = vperm.xlu1 %1459, %v1531_v48  }
 0x2d0   :  { %v964_v50 = vadd.f32 %v963_v49, %v962_v47 }
 0x2d2   :  { %v965_v53 = vrot.slane %v964_v50, 2 }
 0x2d4   :  { %v966_v56 = vadd.f32 %v965_v53, %v964_v50 }
 0x2d6   :  { %v967_v60 = vrot.slane %v966_v56, 1 }
 0x2d8   :  { %v968_v63 = vadd.f32 %v967_v60, %v966_v56 }
 0x2da   :  { %v969_v2 = vadd.f32 %v968_v63, %v959_v62 }
 0x2dc   :  { %971 = vst.msk [vmem:[#allocation3] sm:$0x1] %vm54_vm0, %v969_v2 }
 0x2e3   :  { %v1009_v12 = vld [vmem:[#allocation3] sm:$0x1] }
 0x2e4   :  { %1012 = vperm.xlu1 %1459, %v1009_v12  }
 0x349   :  { %v986_v22 = vpop.permute.xlu0 %985 }
 0x34a   :  { %v991_v23 = vpop.permute.xlu1 %990  ;;  %v993_v24 = vmul.f32 %v986_v22, %v1731_v7 }
 0x34b   :  { %v994_v11 = vmul.f32 0.0, %v991_v23 }
 0x34d   :  { %v995_v25 = vadd.f32 %v994_v11, %v993_v24 }
 0x34e   :  { %v976_v28 = vpop.permute.xlu1 %975 }
 0x34f   :  { %v996_v26 = vrot.slane %v995_v25, 4  ;;  %v981_v31 = vrot.slane %v976_v28, %v1745_v33 }
 0x351   :  { %v997_v27 = vadd.f32 %v996_v26, %v995_v25  ;;  %v982_v36 = vmul.f32 %v981_v31, %v972_v32 }
 0x353   :  { %v998_v29 = vrot.slane %v997_v27, 2 }
 0x355   :  { %v999_v30 = vadd.f32 %v998_v29, %v997_v27 }
 0x357   :  { %v1000_v34 = vrot.slane %v999_v30, 1 }
 0x359   :  { %v1001_v35 = vadd.f32 %v1000_v34, %v999_v30 }
 0x35b   :  { %v1002_v37 = vadd.f32 %v1001_v35, %v982_v36 }
 0x35d   :  { %1003 = vst [vmem:[#allocation4] sm:$0x1] %v1002_v37 }
 0x363   :  { %v1013_v38 = vpop.permute.xlu1 %1012 }
 0x364   :  { %v1018_v39 = vrot.slane %v1013_v38, %v1745_v33  ;;  %v1008_v40 = vld [vmem:[#allocation4] sm:$0x1] }
 0x366   :  { %1532 = vrcp.f32 %v1018_v39 }
 0x370   :  { %v1533_v7 = vpop.eup %1532 }
 0x371   :  { %v1020_v41 = vmul.f32 %v1533_v7, %v1008_v40 }
 0x373   :  { %1391 = vmatmul.mubr.f32.vlgmr.msra.gmra.mrb[8].mxu1 %v1020_v41 }
 0x446   :  { %v1104_v43 = vpop.f32.mrb[8].mxu1 }
 0x447   :  { %v1105_v44 = vadd.f32 %v1104_v43, %v1037_v42  ;;  %v1392_v45 = vpop.f32.mrb[9].mxu1 }
 0x449   :  { %1108 = vst [vmem:[#allocation9] sm:$0x1] %v1105_v44 }
 0x44a   :  { %1567 = shalt.err (!%p1564_p12)
}
 0x44b   :  { %s1568_s15 = scalar_lea.hbm %s1828_s9, 16 }
 0x44c   :  { %p1569_p13 = scmp.ne.s32.totalorder %s1828_s9, %s1568_s15  ;;  %p1572_p0 = scmp.lt.u32.totalorder %s1568_s15, %s1828_s9 }
 0x44e   :  { %p1574_p1 = pnand %p1572_p0, %p1569_p13 }
 0x450   :  { %1577 = shalt.err (!%p1574_p1)
}
 0x451   :  { %1118 = dma.vmem_to_hbm [thread:$0]  %s1116_s10, 16, %s1828_s9, [#allocation8]  }
 0x452   :  { %1580 = dma.done.wait [#allocation8], 16  }
 0x453   :  { %1581 = vsyncadd [#allocation8], 4294967280 }
 0x454   :  { %1122 = vsyncpa [#allocation7], 1 }
 0x455   :  { %1123 = vsyncpa [#allocation8], 1 }

</bundles_post_ra>
